<compile_context>
chip_gen: v7x
topology: tpu7x:2x2x1
jax: 0.10.0
libtpu: 0.0.40
codegen_flags: <defaults>
</compile_context>

<pallas_src>
import jax
import jax.numpy as jnp
from jax import lax
from jax.experimental import pallas as pl
from jax.experimental.pallas import tpu as pltpu


def _aux_kernel(p_ref, w1t_ref, shift_ref, w2t_ref, b2_ref, o_ref):
    # p_ref:     (1, K, TM)        bf16 im2col patches (channel-major layout)
    # w1t_ref:   (Cmid, K)         bf16, BN scale pre-folded
    # shift_ref: (Cmid, 1)         f32  (b1*scale + beta - mean*scale)
    # w2t_ref:   (Cout_pad, Cmid)  bf16
    # b2_ref:    (Cout_pad, 1)     f32
    # o_ref:     (1, Cout_pad, TM) f32
    acc = jnp.dot(w1t_ref[...], p_ref[0],
                  preferred_element_type=jnp.float32)          # (Cmid, TM)
    act = jnp.maximum(acc + shift_ref[...], 0.0)               # BN + ReLU
    # Dropout2d(0.1): identity in eval mode.
    act = act.astype(jnp.bfloat16)
    out = jnp.dot(w2t_ref[...], act,
                  preferred_element_type=jnp.float32)          # (Cout_pad, TM)
    o_ref[0] = (out + b2_ref[...]).astype(o_ref.dtype)


def _round_up(x, m):
    return ((x + m - 1) // m) * m


def _pick_row_tile(hw_pad, n, k, cmid, cout_pad,
                   budget_bytes=20 << 20, cap=4096):
    """Row tile (multiple of 128) dividing hw_pad, sized from a VMEM budget."""
    # Approx. VMEM bytes held per output row: double-buffered bf16 patch block,
    # f32 accumulator + bf16 activation temporaries, double-buffered f32 out.
    per_row = 2 * (2 * k) + 4 * cmid + 2 * cmid + 2 * (4 * cout_pad)
    tm = min(cap, max(128, (budget_bytes // per_row) // 128 * 128))
    while hw_pad % tm != 0:          # hw_pad is a multiple of 128 -> terminates
        tm -= 128
    # v7x has 2 TensorCores: make sure the parallel grid has >= 2 steps.
    if n * (hw_pad // tm) < 2 and tm % 256 == 0:
        tm //= 2
    return tm


def aux_module_forward(x_nchw, params):
    """x_nchw: (N, Cin, H, W) float32. Returns (N, num_classes, H, W) f32."""
    w1, b1, gamma, beta, mean, var, eps, w2, b2 = (
        params["w1"], params["b1"], params["gamma"], params["beta"],
        params["mean"], params["var"], params["eps"], params["w2"],
        params["b2"])

    N, Cin, H, W = x_nchw.shape
    Cmid = w1.shape[-1]
    Cout = w2.shape[-1]
    HW = H * W
    K = 9 * Cin
    HW_pad = _round_up(HW, 128)
    Cout_pad = max(16, _round_up(Cout, 16))

    # --- wrapper-side im2col in channel-major (transposed) layout -----------
    # patches[:, (dy*3+dx)*Cin + c, h*W + w] = x_pad[:, c, h+dy, w+dx]
    x_pad = jnp.pad(x_nchw, ((0, 0), (0, 0), (1, 1), (1, 1)))
    patches = jnp.concatenate(
        [x_pad[:, :, dy:dy + H, dx:dx + W]
         for dy in range(3) for dx in range(3)],
        axis=1).reshape(N, K, HW)                               # (N, 9*Cin, HW)
    if HW_pad != HW:
        patches = jnp.pad(patches, ((0, 0), (0, 0), (0, HW_pad - HW)))
    patches = patches.astype(jnp.bfloat16)

    # --- fold BN scale + conv1 bias into weights / shift --------------------
    scale = gamma / jnp.sqrt(var + eps)                          # (Cmid,)
    shift = (b1 * scale + (beta - mean * scale)).reshape(Cmid, 1)
    w1t = jnp.transpose((w1 * scale[None, None, None, :]).reshape(K, Cmid))
    w1t = w1t.astype(jnp.bfloat16)                               # (Cmid, K)
    w2t = jnp.pad(jnp.transpose(w2), ((0, Cout_pad - Cout), (0, 0)))
    w2t = w2t.astype(jnp.bfloat16)                               # (Cout_pad, Cmid)
    b2_col = jnp.pad(b2, (0, Cout_pad - Cout)).reshape(Cout_pad, 1)

    TM = _pick_row_tile(HW_pad, N, K, Cmid, Cout_pad)
    grid = (N, HW_pad // TM)

    out = pl.pallas_call(
        _aux_kernel,
        out_shape=jax.ShapeDtypeStruct((N, Cout_pad, HW_pad), jnp.float32),
        grid_spec=pltpu.PrefetchScalarGridSpec(
            num_scalar_prefetch=0,
            grid=grid,
            in_specs=[
                pl.BlockSpec((1, K, TM), lambda n, t: (n, 0, t)),
                pl.BlockSpec((Cmid, K), lambda n, t: (0, 0)),
                pl.BlockSpec((Cmid, 1), lambda n, t: (0, 0)),
                pl.BlockSpec((Cout_pad, Cmid), lambda n, t: (0, 0)),
                pl.BlockSpec((Cout_pad, 1), lambda n, t: (0, 0)),
            ],
            out_specs=pl.BlockSpec((1, Cout_pad, TM), lambda n, t: (n, 0, t)),
        ),
        compiler_params=pltpu.CompilerParams(
            dimension_semantics=("parallel", "parallel"),
            vmem_limit_bytes=32 * 1024 * 1024),
    )(patches, w1t, shift, w2t, b2_col)

    # Slice off channel / spatial padding; NCHW is then a pure reshape.
    return out[:, :Cout, :HW].reshape(N, Cout, H, W)


def aux_module_reference(x_nchw, params):
    """Pure-JAX f32 reference (NHWC conv), for correctness check."""
    w1, b1, gamma, beta, mean, var, eps, w2, b2 = (
        params["w1"], params["b1"], params["gamma"], params["beta"],
        params["mean"], params["var"], params["eps"], params["w2"],
        params["b2"])
    x = jnp.transpose(x_nchw, (0, 2, 3, 1))  # NHWC
    y = lax.conv_general_dilated(
        x, w1, window_strides=(1, 1), padding="SAME",
        dimension_numbers=("NHWC", "HWIO", "NHWC"))
    y = y + b1
    y = (y - mean) / jnp.sqrt(var + eps) * gamma + beta
    y = jnp.maximum(y, 0.0)
    y = jnp.einsum("nhwc,cd->nhwd", y, w2) + b2
    return jnp.transpose(y, (0, 3, 1, 2))


def make_params(key, in_planes, num_classes, cmid=256):
    k = jax.random.split(key, 8)
    return {
        "w1": jax.random.normal(k[0], (3, 3, in_planes, cmid), jnp.float32) * 0.05,
        "b1": jax.random.normal(k[1], (cmid,), jnp.float32) * 0.05,
        "gamma": 1.0 + 0.1 * jax.random.normal(k[2], (cmid,), jnp.float32),
        "beta": 0.1 * jax.random.normal(k[3], (cmid,), jnp.float32),
        "mean": 0.1 * jax.random.normal(k[4], (cmid,), jnp.float32),
        "var": jnp.abs(jax.random.normal(k[5], (cmid,), jnp.float32)) + 0.5,
        "eps": jnp.float32(1e-5),
        "w2": jax.random.normal(k[6], (cmid, num_classes), jnp.float32) * 0.05,
        "b2": jax.random.normal(k[7], (num_classes,), jnp.float32) * 0.05,
    }


if __name__ == "__main__":
    N, Cin, H, W = 2, 8, 16, 16
    num_classes = 19

    key = jax.random.PRNGKey(0)
    kx, kp = jax.random.split(key)
    x = jax.random.normal(kx, (N, Cin, H, W), jnp.float32)
    params = make_params(kp, Cin, num_classes)

    out = jax.block_until_ready(aux_module_forward(x, params))
    ref = jax.block_until_ready(aux_module_reference(x, params))

    assert out.shape == (N, num_classes, H, W)
    # bf16 matmul operands (f32 accumulation) -> looser tolerance vs f32 ref.
    assert jnp.allclose(out, ref, atol=3e-2, rtol=3e-2), (
        float(jnp.max(jnp.abs(out - ref))))

    print("KERNEL_OK")
</pallas_src>

<mosaic_0001>
module attributes {stable_mosaic.version = 11 : i64} {
  func.func @_aux_kernel(%arg0: i32, %arg1: i32, %arg2: memref<1x72x256xbf16, #tpu.memory_space<vmem>>, %arg3: memref<256x72xbf16, #tpu.memory_space<vmem>>, %arg4: memref<256x1xf32, #tpu.memory_space<vmem>>, %arg5: memref<32x256xbf16, #tpu.memory_space<vmem>>, %arg6: memref<32x1xf32, #tpu.memory_space<vmem>>, %arg7: memref<1x32x256xf32, #tpu.memory_space<vmem>>) attributes {dimension_semantics = [#tpu.dimension_semantics<parallel>, #tpu.dimension_semantics<parallel>], iteration_bounds = array<i64: 2, 1>, scalar_prefetch = 0 : i64, scratch_operands = 0 : i64, tpu.core_type = #tpu.core_type<tc>, window_params = [{transform_indices = @transform_0, window_bounds = array<i64: 1, 72, 256>}, {pipeline_mode = #tpu.pipeline_mode<synchronous>, transform_indices = @transform_1, window_bounds = array<i64: 256, 72>}, {pipeline_mode = #tpu.pipeline_mode<synchronous>, transform_indices = @transform_2, window_bounds = array<i64: 256, 1>}, {pipeline_mode = #tpu.pipeline_mode<synchronous>, transform_indices = @transform_3, window_bounds = array<i64: 32, 256>}, {pipeline_mode = #tpu.pipeline_mode<synchronous>, transform_indices = @transform_4, window_bounds = array<i64: 32, 1>}, {transform_indices = @transform_5, window_bounds = array<i64: 1, 32, 256>}]} {
    %c0 = arith.constant 0 : index
    %c0_0 = arith.constant 0 : index
    %0 = vector.load %arg3[%c0, %c0_0] : memref<256x72xbf16, #tpu.memory_space<vmem>>, vector<256x72xbf16>
    %c0_1 = arith.constant 0 : index
    %c0_2 = arith.constant 0 : index
    %c0_3 = arith.constant 0 : index
    %1 = vector.load %arg2[%c0_1, %c0_2, %c0_3] : memref<1x72x256xbf16, #tpu.memory_space<vmem>>, vector<1x72x256xbf16>
    %2 = vector.shape_cast %1 : vector<1x72x256xbf16> to vector<72x256xbf16>
    %cst = arith.constant dense<0.000000e+00> : vector<256x256xf32>
    %3 = tpu.matmul %0, %2, %cst {dimension_numbers = #tpu.dot_dimension_numbers<[1], [0], [0], [1], [0, 0, 1, 1], [], []>} : vector<256x72xbf16>, vector<72x256xbf16>, vector<256x256xf32> -> vector<256x256xf32>
    %c0_4 = arith.constant 0 : index
    %c0_5 = arith.constant 0 : index
    %4 = vector.load %arg4[%c0_4, %c0_5] : memref<256x1xf32, #tpu.memory_space<vmem>>, vector<256x1xf32>
    %5 = vector.broadcast %4 : vector<256x1xf32> to vector<256x256xf32>
    %6 = arith.addf %3, %5 : vector<256x256xf32>
    %cst_6 = arith.constant 0.000000e+00 : f32
    %7 = vector.broadcast %cst_6 : f32 to vector<256x256xf32>
    %8 = arith.maximumf %6, %7 : vector<256x256xf32>
    %9 = arith.truncf %8 : vector<256x256xf32> to vector<256x256xbf16>
    %c0_7 = arith.constant 0 : index
    %c0_8 = arith.constant 0 : index
    %10 = vector.load %arg5[%c0_7, %c0_8] : memref<32x256xbf16, #tpu.memory_space<vmem>>, vector<32x256xbf16>
    %cst_9 = arith.constant dense<0.000000e+00> : vector<32x256xf32>
    %11 = tpu.matmul %10, %9, %cst_9 {dimension_numbers = #tpu.dot_dimension_numbers<[1], [0], [0], [1], [0, 0, 1, 1], [], []>} : vector<32x256xbf16>, vector<256x256xbf16>, vector<32x256xf32> -> vector<32x256xf32>
    %c0_10 = arith.constant 0 : index
    %c0_11 = arith.constant 0 : index
    %12 = vector.load %arg6[%c0_10, %c0_11] : memref<32x1xf32, #tpu.memory_space<vmem>>, vector<32x1xf32>
    %13 = vector.broadcast %12 : vector<32x1xf32> to vector<32x256xf32>
    %14 = arith.addf %11, %13 : vector<32x256xf32>
    %c0_12 = arith.constant 0 : index
    %c0_13 = arith.constant 0 : index
    %c0_14 = arith.constant 0 : index
    %15 = vector.load %arg7[%c0_12, %c0_13, %c0_14] : memref<1x32x256xf32, #tpu.memory_space<vmem>>, vector<1x32x256xf32>
    %16 = vector.shape_cast %15 : vector<1x32x256xf32> to vector<32x256xf32>
    %17 = vector.shape_cast %14 : vector<32x256xf32> to vector<1x32x256xf32>
    tpu.vector_store %arg7[%c0_12, %c0_13, %c0_14], %17 {strides = array<i32>} : memref<1x32x256xf32, #tpu.memory_space<vmem>>, vector<1x32x256xf32>,
    return
  }
  func.func @transform_0(%arg0: i32, %arg1: i32) -> (i32, i32, i32) {
    %c0_i32 = arith.constant 0 : i32
    %c0_i32_0 = arith.constant 0 : i32
    return %arg0, %c0_i32, %arg1 : i32, i32, i32
  }
  func.func @transform_1(%arg0: i32, %arg1: i32) -> (i32, i32) {
    %c0_i32 = arith.constant 0 : i32
    %c0_i32_0 = arith.constant 0 : i32
    %c0_i32_1 = arith.constant 0 : i32
    return %c0_i32, %c0_i32_0 : i32, i32
  }
  func.func @transform_2(%arg0: i32, %arg1: i32) -> (i32, i32) {
    %c0_i32 = arith.constant 0 : i32
    %c0_i32_0 = arith.constant 0 : i32
    %c0_i32_1 = arith.constant 0 : i32
    return %c0_i32, %c0_i32_0 : i32, i32
  }
  func.func @transform_3(%arg0: i32, %arg1: i32) -> (i32, i32) {
    %c0_i32 = arith.constant 0 : i32
    %c0_i32_0 = arith.constant 0 : i32
    %c0_i32_1 = arith.constant 0 : i32
    return %c0_i32, %c0_i32_0 : i32, i32
  }
  func.func @transform_4(%arg0: i32, %arg1: i32) -> (i32, i32) {
    %c0_i32 = arith.constant 0 : i32
    %c0_i32_0 = arith.constant 0 : i32
    %c0_i32_1 = arith.constant 0 : i32
    return %c0_i32, %c0_i32_0 : i32, i32
  }
  func.func @transform_5(%arg0: i32, %arg1: i32) -> (i32, i32, i32) {
    %c0_i32 = arith.constant 0 : i32
    %c0_i32_0 = arith.constant 0 : i32
    return %arg0, %c0_i32, %arg1 : i32, i32, i32
  }
}

</mosaic_0001>

<bundles_post_ra>
// kernel: tpu_custom_call.1
= control target key start
LH: loop header
LB: loop body
LE: loop exit
PB: predicated region body
PF: predicated region fallthrough
CT: control target
= control target key end

     0   :  { %10 = vsyncpa [#allocation3], 0  ;;  %s1754_s0 = inlined_call_operand.vmem [shape: bf16[2,72,256], index: 0, kind: input, shape index: {}]   ;;  %s1755_s1 = inlined_call_operand.vmem [shape: bf16[256,72], index: 1, kind: input, shape index: {}]   ;;  %s1756_s2 = inlined_call_operand.vmem [shape: f32[256,1], index: 2, kind: input, shape index: {}]   ;;  %s1757_s3 = inlined_call_operand.vmem [shape: bf16[32,256], index: 3, kind: input, shape index: {}]   ;;  %s1758_s4 = inlined_call_operand.vmem [shape: f32[32,1], index: 4, kind: input, shape index: {}]   ;;  %s1759_s5 = inlined_call_operand.hbm [shape: f32[2,32,256], index: 5, kind: output, shape index: {}]  }
   0x1   :  { %12 = vsyncpa [#allocation3 + $0x1], 0  ;;  %s1433_s18 = smov 0   ;;  %s1435_s19 = smov 0  }
   0x2   :  { %s1437_s20 = smov 0   ;;  %s1439_s21 = smov 0  }
   0x3   :  { %s1441_s22 = smov 0   ;;  %s1443_s23 = smov 0  }
   0x4 LB: > { %s1162_s24 = sadd.s32 4294967295, %s1397_s23   ;;  %s1163_s25 = sadd.s32 4294967294, %s1397_s23   ;;  %s1397_s23 = sphi %s1443_s23, %s18_s23   ;;  %s1393_s22 = sphi %s1441_s22, %s1766_s22   ;;  %s1389_s21 = sphi %s1439_s21, %s1765_s21   ;;  %s1385_s20 = sphi %s1437_s20, %s1764_s20   ;;  %s1381_s19 = sphi %s1435_s19, %s1763_s19   ;;  %s1377_s18 = sphi %s1433_s18, %s1762_s18  }
   0x5   : > { %s30_s26 = sadd.s32 1, %s1393_s22  ;;  %s151_s27 = sadd.s32 1, %s1385_s20 }
   0x6   : > { %p32_p0 = scmp.ge.s32.totalorder %s30_s26, 2  ;;  %p161_p1 = scmp.ne.s32.totalorder %s1385_s20, %s1381_s19 }
   0x7   : > { %p162_p2 = scmp.eq.s32.totalorder %s1162_s24, 1  ;;  %p167_p3 = scmp.ne.s32.totalorder %s1381_s19, %s1377_s18 }
   0x8   : > { %s1768_s26 = smov (%p32_p0, %s30_s26), 0  ;;  %p168_p5 = scmp.eq.s32.totalorder %s1163_s25, 1 }
   0x9   : > { %p1473_p4 = por %p162_p2, %p161_p1  ;;  %s146_s29 = ssub.s32 %s1393_s22, %s1768_s26 }
   0xa   : > { %p1166_p6 = scmp.ge.s32.totalorder %s1397_s23, 1  ;;  %p149_p7 = scmp.eq.s32.totalorder %s146_s29, 0 }
   0xb   : > { %p1480_p8 = por %p168_p5, %p167_p3  ;;  %p211_p9 = scmp.lt.s32.totalorder %s1397_s23, 3 }
   0xc   : > { %s1486_s6 = scalar_select %p149_p7, %s1385_s20, %s151_s27  }
   0xd   : > { %p212_p10 = pnand %p1166_p6, %p211_p9 }
   0xe   : > { %p244_p11 = scmp.lt.s32.totalorder (!%p212_p10), %s1389_s21, 1  ;;  %v1399_v0 = vmov (!%p212_p10), 0   ;;  %v296_v9 = vld [vmem:[%s1756_s2] sm:$0xff] (!%p212_p10)  ;;  %v298_v10 = vld [vmem:[%s1756_s2 + $0x10] sm:$0xff] (!%p212_p10)  ;;  %v297_v12 = vld [vmem:[%s1756_s2 + $0x8] sm:$0xff] (!%p212_p10)  ;;  %vm662_vm0 = vcmask (!%p212_p10), 1043456  }
   0xf   : > { %215 = sbr.rel (%p212_p10) target bundleno = 633 (0x279), region = 40  ;;  %701 = vmatprep.mubr.bf16.mxu0 (!%p212_p10), %v1399_v0  ;;  %1281 = vset.pattern.permute.xlu0 (!%p212_p10), %v1399_v0  ;;  %v299_v13 = vld [vmem:[%s1756_s2 + $0x18] sm:$0xff] (!%p212_p10)  ;;  %v300_v16 = vld [vmem:[%s1756_s2 + $0x20] sm:$0xff] (!%p212_p10)  ;;  %v301_v17 = vld [vmem:[%s1756_s2 + $0x28] sm:$0xff] (!%p212_p10)  ;;  %vm613_vm1 = vcmask (!%p212_p10), 588800   ;;  %s240_s25 = sand.u32 (!%p212_p10), 1, %s1381_s19  }
  0x10   : > { %1282 = vset.pattern.permute.xlu1 (!%p212_p10), %v1399_v0  ;;  %330 = vperm.xlu0 (!%p212_p10), %1281, %v296_v9   ;;  %v1297_v19 = vld [vmem:[%s1755_s1] sm:$0xff] (!%p212_p10)   ;;  %v302_v20 = vld [vmem:[%s1756_s2 + $0x30] sm:$0xff] (!%p212_p10)  ;;  %v303_v21 = vld [vmem:[%s1756_s2 + $0x38] sm:$0xff] (!%p212_p10)  ;;  %s1167_s27 = sshll.u32 (!%p212_p10), %s240_s25, 6  ;;  %s1400_s13 = smov (!%p212_p10), [#allocation2]  }
  0x11   : > { %340 = vperm.xlu1 (!%p212_p10), %1282, %v298_v10   ;;  %v304_v22 = vld [vmem:[%s1756_s2 + $0x40] sm:$0xff] (!%p212_p10)  ;;  %v305_v23 = vld [vmem:[%s1756_s2 + $0x48] sm:$0xff] (!%p212_p10)  ;;  %v306_v25 = vld [vmem:[%s1756_s2 + $0x50] sm:$0xff] (!%p212_p10)  ;;  %s242_s29 = scalar_lea.vmem (!%p212_p10), [#allocation2], %s1167_s27  ;;  %s1323_s14 = sshll.u32 (!%p212_p10), %s1400_s13, 4  ;;  %s1324_s14 = int_to_ptr.vmem [resolvable:$false] %s1323_s14 }
  0x12   : > { %v1298_v24 = vld [vmem:[%s1755_s1 + $0x8] sm:$0xff] (!%p212_p10)   ;;  %v307_v26 = vld [vmem:[%s1756_s2 + $0x58] sm:$0xff] (!%p212_p10)  ;;  %v308_v27 = vld [vmem:[%s1756_s2 + $0x60] sm:$0xff] (!%p212_p10)  ;;  %s1325_s15 = scalar_lea.vmem (!%p212_p10), %s1324_s14, 2048 }
  0x13   : > { %v309_v28 = vld [vmem:[%s1756_s2 + $0x68] sm:$0xff] (!%p212_p10)  ;;  %v1299_v29 = vld [vmem:[%s1755_s1 + $0x10] sm:$0xff] (!%p212_p10)   ;;  %v311_v31 = vld [vmem:[%s1756_s2 + $0x78] sm:$0xff] (!%p212_p10) }
  0x14   : > { %335 = vperm.xlu0 (!%p212_p10), %1281, %v297_v12   ;;  %v310_v30 = vld [vmem:[%s1756_s2 + $0x70] sm:$0xff] (!%p212_p10)  ;;  %v312_v32 = vld [vmem:[%s1756_s2 + $0x80] sm:$0xff] (!%p212_p10)  ;;  %v313_v33 = vld [vmem:[%s1756_s2 + $0x88] sm:$0xff] (!%p212_p10) }
  0x15   : > { %345 = vperm.xlu1 (!%p212_p10), %1282, %v299_v13   ;;  %v1300_v34 = vld [vmem:[%s1755_s1 + $0x18] sm:$0xff] (!%p212_p10)   ;;  %v314_v35 = vld [vmem:[%s1756_s2 + $0x90] sm:$0xff] (!%p212_p10)  ;;  %v316_v37 = vld [vmem:[%s1756_s2 + $0xa0] sm:$0xff] (!%p212_p10) }
  0x16   : > { %s245_s7 = scalar_select %p244_p11, %s1389_s21, 1  ;;  %v315_v36 = vld [vmem:[%s1756_s2 + $0x98] sm:$0xff]  ;;  %v317_v38 = vld [vmem:[%s1756_s2 + $0xa8] sm:$0xff]  ;;  %v1301_v39 = vld [vmem:[%s1755_s1 + $0x20] sm:$0xff]  }
  0x17   : > { %v318_v40 = vld [vmem:[%s1756_s2 + $0xb0] sm:$0xff]  ;;  %v319_v41 = vld [vmem:[%s1756_s2 + $0xb8] sm:$0xff]  ;;  %v320_v42 = vld [vmem:[%s1756_s2 + $0xc0] sm:$0xff] }
  0x18   : > { %s1222_s8 = smul.u32 72, %s245_s7  ;;  %350 = vperm.xlu0 %1281, %v300_v16   ;;  %v321_v43 = vld [vmem:[%s1756_s2 + $0xc8] sm:$0xff]  ;;  %v322_v45 = vld [vmem:[%s1756_s2 + $0xd0] sm:$0xff]  ;;  %v323_v46 = vld [vmem:[%s1756_s2 + $0xd8] sm:$0xff]  ;;  %s1221_s7 = sshll.u32 %s1389_s21, 10 }
  0x19   : > { %355 = vperm.xlu1 %1282, %v301_v17   ;;  %v1302_v44 = vld [vmem:[%s1755_s1 + $0x28] sm:$0xff]   ;;  %v324_v47 = vld [vmem:[%s1756_s2 + $0xe0] sm:$0xff]  ;;  %v1303_v49 = vld [vmem:[%s1755_s1 + $0x30] sm:$0xff]   ;;  %s1708_s21 = scalar_lea.sflag [#allocation3], %s240_s25 }
  0x1a   : > { %s251_s11 = scalar_lea.vmem %s1754_s0, %s1222_s8  ;;  %v325_v48 = vld [vmem:[%s1756_s2 + $0xe8] sm:$0xff]  ;;  %v326_v50 = vld [vmem:[%s1756_s2 + $0xf0] sm:$0xff]  ;;  %v327_v51 = vld [vmem:[%s1756_s2 + $0xf8] sm:$0xff]  ;;  %s1083_s8 = sshll.u32 %s242_s29, 4  ;;  %s1704_s8 = int_to_ptr.vmem [resolvable:$true] %s1083_s8 }
  0x1b   : > { %v1283_v1 = vld [vmem:[%s251_s11 + $0x4] ss:$8 sps:$4 sm:$0xff]   ;;  %v1285_v2 = vld [vmem:[%s251_s11] ss:$8 sps:$4 sm:$0xff]   ;;  %v1286_v3 = vld [vmem:[%s251_s11 + $0x14] ss:$8 sps:$4 sm:$0xff]   ;;  %p1326_p1 = scmp.lt.s32.totalorder %s1704_s8, %s1324_s14 }
  0x1c   : > { %669 = vmatprep.subr.bf16.mxu0 %v1283_v1  ;;  %v1288_v4 = vld [vmem:[%s251_s11 + $0x10] ss:$8 sps:$4 sm:$0xff]   ;;  %v1289_v5 = vld [vmem:[%s251_s11 + $0x24] ss:$8 sps:$4 sm:$0xff]   ;;  %v1291_v6 = vld [vmem:[%s251_s11 + $0x20] ss:$8 sps:$4 sm:$0xff]   ;;  %360 = vperm.xlu0 %1281, %v302_v20  }
  0x1d   : > { %670 = vmatpush1.bf16.msra.mxu0 %v1285_v2  ;;  %v1292_v7 = vld [vmem:[%s251_s11 + $0x34] ss:$8 sps:$4 sm:$0xff]   ;;  %v295_v8 = vld [vmem:[%s251_s11 + $0x40] sm:$0xff]  ;;  %v1294_v11 = vld [vmem:[%s251_s11 + $0x30] ss:$8 sps:$4 sm:$0xff]   ;;  %365 = vperm.xlu1 %1282, %v303_v21   ;;  %s1702_s11 = scalar_lea.hbm %s1759_s5, %s1221_s7  ;;  %s1319_s12 = scalar_lea.vmem %s1704_s8, 1024 }
  0x1e   : > { %671 = vmatprep.subr.bf16.mxu0 %v1286_v3  ;;  %v1194_v14 = vcombine.high %v295_v8, %v295_v8  ;;  %v1193_v15 = vcombine.low %v295_v8, %v295_v8  ;;  %v962_v52 = vld [vmem:[%s1758_s4] sm:$0xff]  ;;  %v963_v53 = vld [vmem:[%s1758_s4 + $0x8] sm:$0xff]  ;;  %v1304_v54 = vld [vmem:[%s1755_s1 + $0x38] sm:$0xff]   ;;  %p1320_p12 = scmp.ne.s32.totalorder %s1704_s8, %s1319_s12  ;;  %p1327_p2 = scmp.lt.s32.totalorder %s1325_s15, %s1319_s12 }
  0x1f   : > { %v964_v55 = vld [vmem:[%s1758_s4 + $0x10] sm:$0xff]  ;;  %v965_v56 = vld [vmem:[%s1758_s4 + $0x18] sm:$0xff]  ;;  %v1305_v57 = vld [vmem:[%s1755_s1 + $0x40] sm:$0xff]  }
  0x20   : > { %v664_v18 = vsel %vm662_vm0, %v1193_v15, 0  ;;  %370 = vperm.xlu0 %1281, %v304_v22   ;;  %v1306_v58 = vld [vmem:[%s1755_s1 + $0x48] sm:$0xff]   ;;  %v1307_v59 = vld [vmem:[%s1755_s1 + $0x50] sm:$0xff]   ;;  %v1308_v60 = vld [vmem:[%s1755_s1 + $0x58] sm:$0xff]   ;;  %p1321_p13 = pnand %p1320_p12, %p1473_p4  ;;  %p1328_p3 = por %p1327_p2, %p1326_p1 }
  0x21   : > { %672 = vmatpush1.bf16.msra.mxu0 %v1288_v4  ;;  %375 = vperm.xlu1 %1282, %v305_v23   ;;  %v1309_v61 = vld [vmem:[%s1755_s1 + $0x60] sm:$0xff]   ;;  %v1310_v62 = vld [vmem:[%s1755_s1 + $0x68] sm:$0xff]   ;;  %v1311_v63 = vld [vmem:[%s1755_s1 + $0x70] sm:$0xff]  }
  0x22   : > { %673 = vmatprep.subr.bf16.mxu0 %v1289_v5  ;;  %v1312_v1 = vld [vmem:[%s1755_s1 + $0x78] sm:$0xff]   ;;  %p1322_p0 = pneg %p1321_p13 }
  0x24   : > { %380 = vperm.xlu0 %1281, %v306_v25   ;;  %p1329_p5 = pnand %p1328_p3, %p1322_p0 }
  0x25   : > { %674 = vmatpush1.bf16.msra.mxu0 %v1291_v6  ;;  %385 = vperm.xlu1 %1282, %v307_v26  }
  0x26   : > { %675 = vmatprep.subr.bf16.mxu0 %v1292_v7 }
  0x28   : > { %390 = vperm.xlu0 %1281, %v308_v27  }
  0x29   : > { %676 = vmatpush1.bf16.msra.mxu0 %v1294_v11  ;;  %395 = vperm.xlu1 %1282, %v309_v28   ;;  %v1315_v11 = vld [vmem:[%s1757_s3 + $0x4] ss:$8 sps:$4 sm:$0xff]  }
  0x2a   : > { %1195 = vmatprep.subr.msk.bf16.mxu0 %vm662_vm0, %v1194_v14  ;;  %1038 = vmatprep.mubr.bf16.mxu1 %v1315_v11 }
  0x2c   : > { %400 = vperm.xlu0 %1281, %v310_v30  }
  0x2d   : > { %678 = vmatpush1.bf16.msra.mxu0 %v664_v18  ;;  %405 = vperm.xlu1 %1282, %v311_v31  }
  0x30   : > { %1196 = vmatmul.mubr.msk.bf16.vlgmr.msra.gmra.mrb[0].mxu0 %vm613_vm1, %v1297_v19  ;;  %410 = vperm.xlu0 %1281, %v312_v32  }
  0x31   : > { %711 = vmatprep.mubr.bf16.mxu0 %v1399_v0  ;;  %415 = vperm.xlu1 %1282, %v313_v33  }
  0x34   : > { %420 = vperm.xlu0 %1281, %v314_v35  }
  0x35   : > { %425 = vperm.xlu1 %1282, %v315_v36  }
  0x38   : > { %1197 = vmatmul.mubr.msk.bf16.gmra.mrb[4].mxu0 %vm613_vm1, %v1298_v24  ;;  %430 = vperm.xlu0 %1281, %v316_v37  }
  0x39   : > { %721 = vmatprep.mubr.bf16.mxu0 %v1399_v0  ;;  %435 = vperm.xlu1 %1282, %v317_v38  }
  0x3c   : > { %440 = vperm.xlu0 %1281, %v318_v40  }
  0x3d   : > { %445 = vperm.xlu1 %1282, %v319_v41  }
  0x40   : > { %1198 = vmatmul.mubr.msk.bf16.gmra.mrb[8].mxu0 %vm613_vm1, %v1299_v29  ;;  %450 = vperm.xlu0 %1281, %v320_v42  }
  0x41   : > { %731 = vmatprep.mubr.bf16.mxu0 %v1399_v0  ;;  %455 = vperm.xlu1 %1282, %v321_v43  }
  0x44   : > { %460 = vperm.xlu0 %1281, %v322_v45  }
  0x45   : > { %465 = vperm.xlu1 %1282, %v323_v46  }
  0x48   : > { %1199 = vmatmul.mubr.msk.bf16.gmra.mrb[12].mxu0 %vm613_vm1, %v1300_v34  ;;  %470 = vperm.xlu0 %1281, %v324_v47  }
  0x49   : > { %741 = vmatprep.mubr.bf16.mxu0 %v1399_v0  ;;  %475 = vperm.xlu1 %1282, %v325_v48  }
  0x4c   : > { %480 = vperm.xlu0 %1281, %v326_v50  }
  0x4d   : > { %485 = vperm.xlu1 %1282, %v327_v51  }
  0x50   : > { %1200 = vmatmul.mubr.msk.bf16.gmra.mrb[16].mxu0 %vm613_vm1, %v1301_v39  ;;  %968 = vperm.xlu0 %1281, %v962_v52  }
  0x51   : > { %751 = vmatprep.mubr.bf16.mxu0 %v1399_v0  ;;  %973 = vperm.xlu1 %1282, %v963_v53  }
  0x54   : > { %978 = vperm.xlu0 %1281, %v964_v55  }
  0x55   : > { %983 = vperm.xlu1 %1282, %v965_v56  }
  0x58   : > { %1201 = vmatmul.mubr.msk.bf16.gmra.mrb[20].mxu0 %vm613_vm1, %v1302_v44 }
  0x59   : > { %761 = vmatprep.mubr.bf16.mxu0 %v1399_v0 }
  0x60   : > { %1202 = vmatmul.mubr.msk.bf16.gmra.mrb[24].mxu0 %vm613_vm1, %v1303_v49 }
  0x61   : > { %771 = vmatprep.mubr.bf16.mxu0 %v1399_v0 }
  0x68   : > { %1203 = vmatmul.mubr.msk.bf16.gmra.mrb[28].mxu0 %vm613_vm1, %v1304_v54 }
  0x69   : > { %781 = vmatprep.mubr.bf16.mxu0 %v1399_v0 }
  0x70   : > { %1204 = vmatmul.mubr.msk.bf16.gmra.mrb[32].mxu0 %vm613_vm1, %v1305_v57 }
  0x71   : > { %791 = vmatprep.mubr.bf16.mxu0 %v1399_v0 }
  0x78   : > { %1205 = vmatmul.mubr.msk.bf16.gmra.mrb[36].mxu0 %vm613_vm1, %v1306_v58 }
  0x79   : > { %801 = vmatprep.mubr.bf16.mxu0 %v1399_v0 }
  0x80   : > { %1206 = vmatmul.mubr.msk.bf16.gmra.mrb[40].mxu0 %vm613_vm1, %v1307_v59 }
  0x81   : > { %811 = vmatprep.mubr.bf16.mxu0 %v1399_v0 }
  0x88   : > { %1207 = vmatmul.mubr.msk.bf16.gmra.mrb[44].mxu0 %vm613_vm1, %v1308_v60 }
  0x89   : > { %821 = vmatprep.mubr.bf16.mxu0 %v1399_v0 }
  0x8f   : > { %v331_v2 = vpop.permute.xlu0 %330 }
  0x90   : > { %1208 = vmatmul.mubr.msk.bf16.gmra.mrb[48].mxu0 %vm613_vm1, %v1309_v61 }
  0x91   : > { %831 = vmatprep.mubr.bf16.mxu0 %v1399_v0 }
  0x93   : > { %v336_v6 = vpop.permute.xlu0 %335 }
  0x97   : > { %v351_v33 = vpop.permute.xlu0 %350 }
  0x98   : > { %1209 = vmatmul.mubr.msk.bf16.gmra.mrb[52].mxu0 %vm613_vm1, %v1310_v62 }
  0x99   : > { %841 = vmatprep.mubr.bf16.mxu0 %v1399_v0 }
  0x9b   : > { %v361_v49 = vpop.permute.xlu0 %360 }
  0xa0   : > { %1210 = vmatmul.mubr.msk.bf16.gmra.mrb[56].mxu0 %vm613_vm1, %v1311_v63 }
  0xa1   : > { %851 = vmatprep.mubr.bf16.mxu0 %v1399_v0  ;;  %v341_v0 = vpop.permute.xlu1 %340 }
  0xa5   : > { %v346_v22 = vpop.permute.xlu1 %345 }
  0xa8   : > { %1211 = vmatmul.mubr.msk.bf16.gmra.mrb[60].mxu0 %vm613_vm1, %v1312_v1 }
  0xa9   : > { %v356_v38 = vpop.permute.xlu1 %355 }
  0xad   : > { %v366_v54 = vpop.permute.xlu1 %365 }
 0x103   : > { %v703_v3 = vpop.f32.mrb[0].mxu0 }
 0x104   : > { %v704_v4 = vadd.f32 %v703_v3, %v331_v2  ;;  %v705_v5 = vpop.f32.mrb[1].mxu0 }
 0x105   : > { %v706_v7 = vadd.f32 %v705_v5, %v331_v2  ;;  %v707_v8 = vpop.f32.mrb[2].mxu0  ;;  %v371_v2 = vpop.permute.xlu0 %370 }
 0x106   : > { %v708_v9 = vadd.f32 %v707_v8, %v336_v6  ;;  %v709_v10 = vpop.f32.mrb[3].mxu0  ;;  %v862_v13 = vmax.f32 %v704_v4, 0.0 }
 0x107   : > { %v710_v12 = vadd.f32 %v709_v10, %v336_v6  ;;  %v863_v15 = vmax.f32 %v706_v7, 0.0  ;;  %v376_v7 = vpop.permute.xlu1 %375 }
 0x108   : > { %v864_v14 = vmax.f32 %v708_v9, 0.0 }
 0x109   : > { %v865_v16 = vmax.f32 %v710_v12, 0.0 }
 0x10a   : > { %v926_v17 = vpack.c.bf16 %v864_v14, %v862_v13 }
 0x10b   : > { %v713_v18 = vpop.f32.mrb[4].mxu0  ;;  %v927_v19 = vpack.c.bf16 %v865_v16, %v863_v15 }
 0x10c   : > { %v714_v20 = vadd.f32 %v713_v18, %v341_v0  ;;  %v715_v21 = vpop.f32.mrb[5].mxu0 }
 0x10d   : > { %v716_v23 = vadd.f32 %v715_v21, %v341_v0  ;;  %v717_v24 = vpop.f32.mrb[6].mxu0  ;;  %1006 = vmatprep.subr.bf16.mxu1 %v927_v19 }
 0x10e   : > { %v718_v25 = vadd.f32 %v717_v24, %v346_v22  ;;  %v719_v26 = vpop.f32.mrb[7].mxu0  ;;  %1007 = vmatpush1.bf16.msra.mxu1 %v926_v17  ;;  %v866_v28 = vmax.f32 %v714_v20, 0.0  ;;  %v381_v17 = vpop.permute.xlu0 %380 }
 0x10f   : > { %v720_v27 = vadd.f32 %v719_v26, %v346_v22  ;;  %v867_v30 = vmax.f32 %v716_v23, 0.0  ;;  %v386_v22 = vpop.permute.xlu1 %385 }
 0x110   : > { %v868_v29 = vmax.f32 %v718_v25, 0.0 }
 0x111   : > { %v869_v31 = vmax.f32 %v720_v27, 0.0 }
 0x112   : > { %v928_v32 = vpack.c.bf16 %v868_v29, %v866_v28 }
 0x113   : > { %v929_v34 = vpack.c.bf16 %v869_v31, %v867_v30  ;;  %v723_v35 = vpop.f32.mrb[8].mxu0 }
 0x114   : > { %v724_v36 = vadd.f32 %v723_v35, %v351_v33  ;;  %v725_v37 = vpop.f32.mrb[9].mxu0 }
 0x115   : > { %v726_v39 = vadd.f32 %v725_v37, %v351_v33  ;;  %v727_v40 = vpop.f32.mrb[10].mxu0  ;;  %1008 = vmatprep.subr.bf16.mxu1 %v929_v34  ;;  %v391_v33 = vpop.permute.xlu0 %390 }
 0x116   : > { %v728_v41 = vadd.f32 %v727_v40, %v356_v38  ;;  %v729_v42 = vpop.f32.mrb[11].mxu0  ;;  %1009 = vmatpush1.bf16.msra.mxu1 %v928_v32  ;;  %v870_v44 = vmax.f32 %v724_v36, 0.0 }
 0x117   : > { %v730_v43 = vadd.f32 %v729_v42, %v356_v38  ;;  %v871_v46 = vmax.f32 %v726_v39, 0.0  ;;  %v396_v38 = vpop.permute.xlu1 %395 }
 0x118   : > { %v872_v45 = vmax.f32 %v728_v41, 0.0 }
 0x119   : > { %v873_v47 = vmax.f32 %v730_v43, 0.0 }
 0x11a   : > { %v930_v48 = vpack.c.bf16 %v872_v45, %v870_v44 }
 0x11b   : > { %v931_v50 = vpack.c.bf16 %v873_v47, %v871_v46  ;;  %v733_v51 = vpop.f32.mrb[12].mxu0 }
 0x11c   : > { %v734_v52 = vadd.f32 %v733_v51, %v361_v49  ;;  %v735_v53 = vpop.f32.mrb[13].mxu0 }
 0x11d   : > { %v736_v55 = vadd.f32 %v735_v53, %v361_v49  ;;  %v737_v56 = vpop.f32.mrb[14].mxu0  ;;  %1010 = vmatprep.subr.bf16.mxu1 %v931_v50  ;;  %v401_v49 = vpop.permute.xlu0 %400 }
 0x11e   : > { %v738_v57 = vadd.f32 %v737_v56, %v366_v54  ;;  %v739_v58 = vpop.f32.mrb[15].mxu0  ;;  %1011 = vmatpush1.bf16.msra.mxu1 %v930_v48  ;;  %v874_v60 = vmax.f32 %v734_v52, 0.0 }
 0x11f   : > { %v740_v59 = vadd.f32 %v739_v58, %v366_v54  ;;  %v875_v62 = vmax.f32 %v736_v55, 0.0  ;;  %v406_v54 = vpop.permute.xlu1 %405 }
 0x120   : > { %v876_v61 = vmax.f32 %v738_v57, 0.0 }
 0x121   : > { %v877_v63 = vmax.f32 %v740_v59, 0.0 }
 0x122   : > { %v932_v1 = vpack.c.bf16 %v876_v61, %v874_v60 }
 0x123   : > { %v933_v3 = vpack.c.bf16 %v877_v63, %v875_v62  ;;  %v743_v4 = vpop.f32.mrb[16].mxu0 }
 0x124   : > { %v744_v5 = vadd.f32 %v743_v4, %v371_v2  ;;  %v745_v6 = vpop.f32.mrb[17].mxu0 }
 0x125   : > { %v746_v8 = vadd.f32 %v745_v6, %v371_v2  ;;  %v747_v9 = vpop.f32.mrb[18].mxu0  ;;  %1012 = vmatprep.subr.bf16.mxu1 %v933_v3  ;;  %v411_v2 = vpop.permute.xlu0 %410 }
 0x126   : > { %v748_v10 = vadd.f32 %v747_v9, %v376_v7  ;;  %v749_v11 = vpop.f32.mrb[19].mxu0  ;;  %1013 = vmatpush1.bf16.msra.mxu1 %v932_v1  ;;  %v878_v12 = vmax.f32 %v744_v5, 0.0 }
 0x127   : > { %v750_v0 = vadd.f32 %v749_v11, %v376_v7  ;;  %v879_v14 = vmax.f32 %v746_v8, 0.0  ;;  %v416_v7 = vpop.permute.xlu1 %415 }
 0x128   : > { %v880_v13 = vmax.f32 %v748_v10, 0.0 }
 0x129   : > { %v881_v15 = vmax.f32 %v750_v0, 0.0 }
 0x12a   : > { %v934_v16 = vpack.c.bf16 %v880_v13, %v878_v12 }
 0x12b   : > { %v935_v18 = vpack.c.bf16 %v881_v15, %v879_v14  ;;  %v753_v19 = vpop.f32.mrb[20].mxu0 }
 0x12c   : > { %v754_v20 = vadd.f32 %v753_v19, %v381_v17  ;;  %v755_v21 = vpop.f32.mrb[21].mxu0 }
 0x12d   : > { %v756_v23 = vadd.f32 %v755_v21, %v381_v17  ;;  %v757_v24 = vpop.f32.mrb[22].mxu0  ;;  %1014 = vmatprep.subr.bf16.mxu1 %v935_v18  ;;  %v421_v17 = vpop.permute.xlu0 %420 }
 0x12e   : > { %v758_v25 = vadd.f32 %v757_v24, %v386_v22  ;;  %v759_v26 = vpop.f32.mrb[23].mxu0  ;;  %1015 = vmatpush1.bf16.msra.mxu1 %v934_v16  ;;  %v882_v28 = vmax.f32 %v754_v20, 0.0 }
 0x12f   : > { %v760_v27 = vadd.f32 %v759_v26, %v386_v22  ;;  %v883_v30 = vmax.f32 %v756_v23, 0.0  ;;  %v426_v22 = vpop.permute.xlu1 %425 }
 0x130   : > { %v884_v29 = vmax.f32 %v758_v25, 0.0 }
 0x131   : > { %v885_v31 = vmax.f32 %v760_v27, 0.0 }
 0x132   : > { %v936_v32 = vpack.c.bf16 %v884_v29, %v882_v28 }
 0x133   : > { %v937_v34 = vpack.c.bf16 %v885_v31, %v883_v30  ;;  %v763_v35 = vpop.f32.mrb[24].mxu0 }
 0x134   : > { %v764_v36 = vadd.f32 %v763_v35, %v391_v33  ;;  %v765_v37 = vpop.f32.mrb[25].mxu0 }
 0x135   : > { %v766_v39 = vadd.f32 %v765_v37, %v391_v33  ;;  %v767_v40 = vpop.f32.mrb[26].mxu0  ;;  %1016 = vmatprep.subr.bf16.mxu1 %v937_v34  ;;  %v431_v33 = vpop.permute.xlu0 %430 }
 0x136   : > { %v768_v41 = vadd.f32 %v767_v40, %v396_v38  ;;  %v769_v42 = vpop.f32.mrb[27].mxu0  ;;  %1017 = vmatpush1.bf16.msra.mxu1 %v936_v32  ;;  %v886_v44 = vmax.f32 %v764_v36, 0.0 }
 0x137   : > { %v770_v43 = vadd.f32 %v769_v42, %v396_v38  ;;  %v887_v46 = vmax.f32 %v766_v39, 0.0  ;;  %v436_v38 = vpop.permute.xlu1 %435 }
 0x138   : > { %v888_v45 = vmax.f32 %v768_v41, 0.0 }
 0x139   : > { %v889_v47 = vmax.f32 %v770_v43, 0.0 }
 0x13a   : > { %v938_v48 = vpack.c.bf16 %v888_v45, %v886_v44 }
 0x13b   : > { %v939_v50 = vpack.c.bf16 %v889_v47, %v887_v46  ;;  %v773_v51 = vpop.f32.mrb[28].mxu0 }
 0x13c   : > { %v774_v52 = vadd.f32 %v773_v51, %v401_v49  ;;  %v775_v53 = vpop.f32.mrb[29].mxu0 }
 0x13d   : > { %v776_v55 = vadd.f32 %v775_v53, %v401_v49  ;;  %v777_v56 = vpop.f32.mrb[30].mxu0  ;;  %1018 = vmatprep.subr.bf16.mxu1 %v939_v50  ;;  %v441_v49 = vpop.permute.xlu0 %440 }
 0x13e   : > { %v778_v57 = vadd.f32 %v777_v56, %v406_v54  ;;  %v779_v58 = vpop.f32.mrb[31].mxu0  ;;  %1019 = vmatpush1.bf16.msra.mxu1 %v938_v48  ;;  %v890_v60 = vmax.f32 %v774_v52, 0.0 }
 0x13f   : > { %v780_v59 = vadd.f32 %v779_v58, %v406_v54  ;;  %v891_v62 = vmax.f32 %v776_v55, 0.0  ;;  %v446_v54 = vpop.permute.xlu1 %445 }
 0x140   : > { %v892_v61 = vmax.f32 %v778_v57, 0.0 }
 0x141   : > { %v893_v63 = vmax.f32 %v780_v59, 0.0 }
 0x142   : > { %v940_v1 = vpack.c.bf16 %v892_v61, %v890_v60 }
 0x143   : > { %v941_v3 = vpack.c.bf16 %v893_v63, %v891_v62  ;;  %v783_v4 = vpop.f32.mrb[32].mxu0 }
 0x144   : > { %v784_v5 = vadd.f32 %v783_v4, %v411_v2  ;;  %v785_v6 = vpop.f32.mrb[33].mxu0 }
 0x145   : > { %v786_v8 = vadd.f32 %v785_v6, %v411_v2  ;;  %v787_v9 = vpop.f32.mrb[34].mxu0  ;;  %1020 = vmatprep.subr.bf16.mxu1 %v941_v3  ;;  %v451_v2 = vpop.permute.xlu0 %450 }
 0x146   : > { %v788_v10 = vadd.f32 %v787_v9, %v416_v7  ;;  %v789_v11 = vpop.f32.mrb[35].mxu0  ;;  %1021 = vmatpush1.bf16.msra.mxu1 %v940_v1  ;;  %v894_v12 = vmax.f32 %v784_v5, 0.0 }
 0x147   : > { %v790_v0 = vadd.f32 %v789_v11, %v416_v7  ;;  %v895_v14 = vmax.f32 %v786_v8, 0.0  ;;  %v456_v7 = vpop.permute.xlu1 %455 }
 0x148   : > { %v896_v13 = vmax.f32 %v788_v10, 0.0 }
 0x149   : > { %v897_v15 = vmax.f32 %v790_v0, 0.0 }
 0x14a   : > { %v942_v16 = vpack.c.bf16 %v896_v13, %v894_v12 }
 0x14b   : > { %v943_v18 = vpack.c.bf16 %v897_v15, %v895_v14  ;;  %v793_v19 = vpop.f32.mrb[36].mxu0 }
 0x14c   : > { %v794_v20 = vadd.f32 %v793_v19, %v421_v17  ;;  %v795_v21 = vpop.f32.mrb[37].mxu0 }
 0x14d   : > { %v796_v23 = vadd.f32 %v795_v21, %v421_v17  ;;  %v797_v24 = vpop.f32.mrb[38].mxu0  ;;  %1022 = vmatprep.subr.bf16.mxu1 %v943_v18  ;;  %v461_v17 = vpop.permute.xlu0 %460 }
 0x14e   : > { %v798_v25 = vadd.f32 %v797_v24, %v426_v22  ;;  %v799_v26 = vpop.f32.mrb[39].mxu0  ;;  %1023 = vmatpush1.bf16.msra.mxu1 %v942_v16  ;;  %v898_v28 = vmax.f32 %v794_v20, 0.0 }
 0x14f   : > { %v800_v27 = vadd.f32 %v799_v26, %v426_v22  ;;  %v899_v30 = vmax.f32 %v796_v23, 0.0  ;;  %v466_v22 = vpop.permute.xlu1 %465 }
 0x150   : > { %v900_v29 = vmax.f32 %v798_v25, 0.0 }
 0x151   : > { %v901_v31 = vmax.f32 %v800_v27, 0.0 }
 0x152   : > { %v944_v32 = vpack.c.bf16 %v900_v29, %v898_v28 }
 0x153   : > { %v945_v34 = vpack.c.bf16 %v901_v31, %v899_v30  ;;  %v803_v35 = vpop.f32.mrb[40].mxu0 }
 0x154   : > { %v804_v36 = vadd.f32 %v803_v35, %v431_v33  ;;  %v805_v37 = vpop.f32.mrb[41].mxu0 }
 0x155   : > { %v806_v39 = vadd.f32 %v805_v37, %v431_v33  ;;  %v807_v40 = vpop.f32.mrb[42].mxu0  ;;  %1024 = vmatprep.subr.bf16.mxu1 %v945_v34  ;;  %v471_v33 = vpop.permute.xlu0 %470 }
 0x156   : > { %v808_v41 = vadd.f32 %v807_v40, %v436_v38  ;;  %v809_v42 = vpop.f32.mrb[43].mxu0  ;;  %1025 = vmatpush1.bf16.msra.mxu1 %v944_v32  ;;  %v902_v44 = vmax.f32 %v804_v36, 0.0 }
 0x157   : > { %v810_v43 = vadd.f32 %v809_v42, %v436_v38  ;;  %v903_v46 = vmax.f32 %v806_v39, 0.0  ;;  %v476_v38 = vpop.permute.xlu1 %475 }
 0x158   : > { %v904_v45 = vmax.f32 %v808_v41, 0.0 }
 0x159   : > { %v905_v47 = vmax.f32 %v810_v43, 0.0 }
 0x15a   : > { %v946_v48 = vpack.c.bf16 %v904_v45, %v902_v44 }
 0x15b   : > { %v947_v50 = vpack.c.bf16 %v905_v47, %v903_v46  ;;  %v813_v51 = vpop.f32.mrb[44].mxu0 }
 0x15c   : > { %v814_v52 = vadd.f32 %v813_v51, %v441_v49  ;;  %v815_v53 = vpop.f32.mrb[45].mxu0 }
 0x15d   : > { %v816_v55 = vadd.f32 %v815_v53, %v441_v49  ;;  %v817_v56 = vpop.f32.mrb[46].mxu0  ;;  %1026 = vmatprep.subr.bf16.mxu1 %v947_v50  ;;  %v481_v49 = vpop.permute.xlu0 %480 }
 0x15e   : > { %v818_v57 = vadd.f32 %v817_v56, %v446_v54  ;;  %v819_v58 = vpop.f32.mrb[47].mxu0  ;;  %1027 = vmatpush1.bf16.msra.mxu1 %v946_v48  ;;  %v906_v60 = vmax.f32 %v814_v52, 0.0 }
 0x15f   : > { %v820_v59 = vadd.f32 %v819_v58, %v446_v54  ;;  %v907_v62 = vmax.f32 %v816_v55, 0.0  ;;  %v486_v54 = vpop.permute.xlu1 %485 }
 0x160   : > { %v908_v61 = vmax.f32 %v818_v57, 0.0 }
 0x161   : > { %v909_v63 = vmax.f32 %v820_v59, 0.0 }
 0x162   : > { %v948_v1 = vpack.c.bf16 %v908_v61, %v906_v60 }
 0x163   : > { %v949_v3 = vpack.c.bf16 %v909_v63, %v907_v62  ;;  %v823_v4 = vpop.f32.mrb[48].mxu0 }
 0x164   : > { %v824_v5 = vadd.f32 %v823_v4, %v451_v2  ;;  %v825_v6 = vpop.f32.mrb[49].mxu0  ;;  %v1316_v4 = vld [vmem:[%s1757_s3 + $0x14] ss:$8 sps:$4 sm:$0xff]  }
 0x165   : > { %v826_v8 = vadd.f32 %v825_v6, %v451_v2  ;;  %v827_v9 = vpop.f32.mrb[50].mxu0  ;;  %1028 = vmatprep.subr.bf16.mxu1 %v949_v3  ;;  %v1313_v3 = vld [vmem:[%s1757_s3] ss:$8 sps:$4 sm:$0xff]   ;;  %v969_v6 = vpop.permute.xlu0 %968 }
 0x166   : > { %v828_v10 = vadd.f32 %v827_v9, %v456_v7  ;;  %v829_v11 = vpop.f32.mrb[51].mxu0  ;;  %1029 = vmatpush1.bf16.msra.mxu1 %v948_v1  ;;  %v910_v12 = vmax.f32 %v824_v5, 0.0  ;;  %v1318_v5 = vld [vmem:[%s1757_s3 + $0x10] ss:$8 sps:$4 sm:$0xff]  }
 0x167   : > { %v830_v0 = vadd.f32 %v829_v11, %v456_v7  ;;  %v911_v14 = vmax.f32 %v826_v8, 0.0 }
 0x168   : > { %v912_v13 = vmax.f32 %v828_v10, 0.0  ;;  %v974_v10 = vpop.permute.xlu1 %973 }
 0x169   : > { %v913_v15 = vmax.f32 %v830_v0, 0.0 }
 0x16a   : > { %v950_v16 = vpack.c.bf16 %v912_v13, %v910_v12 }
 0x16b   : > { %v951_v18 = vpack.c.bf16 %v913_v15, %v911_v14  ;;  %v833_v19 = vpop.f32.mrb[52].mxu0  ;;  %v979_v15 = vpop.permute.xlu0 %978 }
 0x16c   : > { %v834_v20 = vadd.f32 %v833_v19, %v461_v17  ;;  %v835_v21 = vpop.f32.mrb[53].mxu0  ;;  %v984_v19 = vpop.permute.xlu1 %983 }
 0x16d   : > { %v836_v23 = vadd.f32 %v835_v21, %v461_v17  ;;  %v837_v24 = vpop.f32.mrb[54].mxu0  ;;  %1030 = vmatprep.subr.bf16.mxu1 %v951_v18 }
 0x16e   : > { %v838_v25 = vadd.f32 %v837_v24, %v466_v22  ;;  %v839_v26 = vpop.f32.mrb[55].mxu0  ;;  %1031 = vmatpush1.bf16.msra.mxu1 %v950_v16  ;;  %v914_v28 = vmax.f32 %v834_v20, 0.0 }
 0x16f   : > { %v840_v27 = vadd.f32 %v839_v26, %v466_v22  ;;  %v915_v30 = vmax.f32 %v836_v23, 0.0 }
 0x170   : > { %v916_v29 = vmax.f32 %v838_v25, 0.0 }
 0x171   : > { %v917_v31 = vmax.f32 %v840_v27, 0.0 }
 0x172   : > { %v952_v32 = vpack.c.bf16 %v916_v29, %v914_v28 }
 0x173   : > { %v953_v34 = vpack.c.bf16 %v917_v31, %v915_v30  ;;  %v843_v35 = vpop.f32.mrb[56].mxu0 }
 0x174   : > { %v844_v36 = vadd.f32 %v843_v35, %v471_v33  ;;  %v845_v37 = vpop.f32.mrb[57].mxu0 }
 0x175   : > { %v846_v39 = vadd.f32 %v845_v37, %v471_v33  ;;  %v847_v40 = vpop.f32.mrb[58].mxu0  ;;  %1032 = vmatprep.subr.bf16.mxu1 %v953_v34 }
 0x176   : > { %v848_v41 = vadd.f32 %v847_v40, %v476_v38  ;;  %v849_v42 = vpop.f32.mrb[59].mxu0  ;;  %1033 = vmatpush1.bf16.msra.mxu1 %v952_v32  ;;  %v918_v44 = vmax.f32 %v844_v36, 0.0 }
 0x177   : > { %v850_v43 = vadd.f32 %v849_v42, %v476_v38  ;;  %v919_v46 = vmax.f32 %v846_v39, 0.0 }
 0x178   : > { %v920_v45 = vmax.f32 %v848_v41, 0.0 }
 0x179   : > { %v921_v47 = vmax.f32 %v850_v43, 0.0 }
 0x17a   : > { %v954_v48 = vpack.c.bf16 %v920_v45, %v918_v44 }
 0x17b   : > { %v955_v50 = vpack.c.bf16 %v921_v47, %v919_v46  ;;  %v853_v51 = vpop.f32.mrb[60].mxu0 }
 0x17c   : > { %v854_v52 = vadd.f32 %v853_v51, %v481_v49  ;;  %v855_v53 = vpop.f32.mrb[61].mxu0 }
 0x17d   : > { %v856_v55 = vadd.f32 %v855_v53, %v481_v49  ;;  %v857_v56 = vpop.f32.mrb[62].mxu0  ;;  %1034 = vmatprep.subr.bf16.mxu1 %v955_v50 }
 0x17e   : > { %v858_v57 = vadd.f32 %v857_v56, %v486_v54  ;;  %v859_v58 = vpop.f32.mrb[63].mxu0  ;;  %1035 = vmatpush1.bf16.msra.mxu1 %v954_v48  ;;  %v922_v60 = vmax.f32 %v854_v52, 0.0 }
 0x17f   : > { %v860_v59 = vadd.f32 %v859_v58, %v486_v54  ;;  %v923_v62 = vmax.f32 %v856_v55, 0.0 }
 0x180   : > { %v924_v61 = vmax.f32 %v858_v57, 0.0 }
 0x181   : > { %v925_v63 = vmax.f32 %v860_v59, 0.0 }
 0x182   : > { %v956_v1 = vpack.c.bf16 %v924_v61, %v922_v60 }
 0x183   : > { %v957_v2 = vpack.c.bf16 %v925_v63, %v923_v62 }
 0x185   : > { %1036 = vmatprep.subr.bf16.mxu1 %v957_v2 }
 0x186   : > { %1037 = vmatpush1.bf16.msra.mxu1 %v956_v1 }
 0x189   : > { %1039 = vmatmul.mubr.bf16.vlgmr.msra.gmra.mrb[0].mxu1 %v1313_v3 }
 0x18a   : > { %1048 = vmatprep.mubr.bf16.mxu1 %v1316_v4 }
 0x191   : > { %1049 = vmatmul.mubr.bf16.gmra.mrb[4].mxu1 %v1318_v5 }
 0x25c   : > { %v1040_v7 = vpop.f32.mrb[0].mxu1 }
 0x25d   : > { %v1041_v8 = vadd.f32 %v1040_v7, %v969_v6  ;;  %v1042_v9 = vpop.f32.mrb[1].mxu1 }
 0x25e   : > { %v1043_v11 = vadd.f32 %v1042_v9, %v969_v6  ;;  %v1044_v0 = vpop.f32.mrb[2].mxu1 }
 0x25f   : > { %1059 = vst [vmem:[%s242_s29] sm:$0xff] %v1041_v8  ;;  %v1045_v12 = vadd.f32 %v1044_v0, %v974_v10  ;;  %v1046_v13 = vpop.f32.mrb[3].mxu1 }
 0x260   : > { %1060 = vst [vmem:[%s242_s29 + $0x8] sm:$0xff] %v1043_v11  ;;  %v1047_v14 = vadd.f32 %v1046_v13, %v974_v10 }
 0x261   : > { %1061 = vst [vmem:[%s242_s29 + $0x10] sm:$0xff] %v1045_v12 }
 0x262   : > { %1062 = vst [vmem:[%s242_s29 + $0x18] sm:$0xff] %v1047_v14 }
 0x264   : > { %v1050_v16 = vpop.f32.mrb[4].mxu1 }
 0x265   : > { %v1051_v17 = vadd.f32 %v1050_v16, %v979_v15  ;;  %v1052_v18 = vpop.f32.mrb[5].mxu1 }
 0x266   : > { %v1053_v20 = vadd.f32 %v1052_v18, %v979_v15  ;;  %v1054_v21 = vpop.f32.mrb[6].mxu1 }
 0x267   : > { %1063 = vst [vmem:[%s242_s29 + $0x20] sm:$0xff] %v1051_v17  ;;  %v1055_v22 = vadd.f32 %v1054_v21, %v984_v19  ;;  %v1056_v23 = vpop.f32.mrb[7].mxu1 }
 0x268   : > { %1064 = vst [vmem:[%s242_s29 + $0x28] sm:$0xff] %v1053_v20  ;;  %v1057_v24 = vadd.f32 %v1056_v23, %v984_v19 }
 0x269   : > { %1065 = vst [vmem:[%s242_s29 + $0x30] sm:$0xff] %v1055_v22 }
 0x26a   : > { %1066 = vst [vmem:[%s242_s29 + $0x38] sm:$0xff] %v1057_v24 }
 0x26b   : > { %1332 = shalt.err (!%p1329_p5)
}
 0x26c   : > { %s1333_s16 = scalar_lea.hbm %s1702_s11, 1024  ;;  %s1337_s25 = scalar_lea.hbm %s1759_s5, 2048 }
 0x26d   : > { %p1334_p6 = scmp.ne.s32.totalorder %s1702_s11, %s1333_s16  ;;  %p1338_p10 = scmp.lt.u32.totalorder %s1702_s11, %s1759_s5 }
 0x26e   : > { %p1339_p11 = scmp.lt.u32.totalorder %s1337_s25, %s1333_s16  ;;  %p1341_p13 = scmp.lt.u32.totalorder %s1333_s16, %s1702_s11 }
 0x26f   : > { %p1335_p7 = pnand %p1334_p6, %p1473_p4 }
 0x270   : > { %p1340_p12 = por %p1339_p11, %p1338_p10 }
 0x271   : > { %p1336_p9 = pneg %p1335_p7 }
 0x272   : > { %p1342_p0 = por %p1341_p13, %p1340_p12 }
 0x274   : > { %p1343_p1 = pnand %p1342_p0, %p1336_p9 }
 0x276   : > { %1346 = shalt.err (!%p1343_p1)
}
 0x277   : > { %s1401_s7 = smov 256   ;;  %s1402_s9 = smov 16  }
 0x278   : > { %1223 = dma.vmem_to_hbm [thread:$0]  (%p1473_p4), %s1704_s8, 1024, %s1702_s11, %s1708_s21, %s1401_s7, %s1401_s7, %s1402_s9  }
 0x279 PF: > { %p1229_p2 = scmp.ge.s32.totalorder %s1397_s23, 2  ;;  %s1098_s10 = sand.u32 1, %s1377_s18  }
 0x27a   : > { %s1099_s12 = scalar_lea.sflag [#allocation3], %s1098_s10 }
 0x27b   : > { %p1226_p3 = pnand %p1229_p2, %p1480_p8 }
 0x27d   : > { %1372 = dma.done.wait (!%p1226_p3), %s1099_s12, 1024  }
 0x27e   : > { %1374 = vsyncadd (!%p1226_p3), %s1099_s12, 4294966272  ;;  %s18_s23 = sadd.s32 1, %s1397_s23   ;;  %s1762_s18 = smov %s1381_s19 }
 0x27f   : > { %p15_p5 = scmp.ge.s32.totalorder %s18_s23, 4   ;;  %s1763_s19 = smov %s1385_s20 }
 0x280   : > { %s1764_s20 = smov %s1486_s6  ;;  %s1765_s21 = smov %s1393_s22 }
 0x281   : > { %s1766_s22 = smov %s1768_s26  ;;  %17 = sbr.rel (!%p15_p5) target bundleno = 4 (0x4), region = 75 }
 0x288   :  { %1104 = vsyncpa [#allocation3], 1 }
 0x289   :  { %1106 = vsyncpa [#allocation3 + $0x1], 1 }

</bundles_post_ra>
